<compile_context>
chip_gen: v5e
topology: v5e:2x2
jax: 0.10.0
libtpu: 0.0.40
codegen_flags: <defaults>
</compile_context>

<pallas_src>
import math

import jax
import jax.numpy as jnp
from jax.experimental import pallas as pl
from jax.experimental.pallas import tpu as pltpu

# NewGELU constants (module defaults).
GELU_C = math.sqrt(2.0 / math.pi)
F0 = 0.044715   # cubic coefficient
F2 = 0.5        # outer scale
F3 = 1.0        # tanh offset
# f1 = 3.0 is realised exactly as x*x*x (integral power), matching torch.pow(x, 3.0).


def new_gelu_kernel(x_ref, o_ref):
    x = x_ref[...].astype(jnp.float32)
    a = x + F0 * (x * x * x)
    y = F2 * x * (F3 + jnp.tanh(GELU_C * a))
    o_ref[...] = y.astype(o_ref.dtype)


def new_gelu_ref(x):
    """Pure-JAX reference of the module forward (for correctness checks)."""
    a = x + F0 * (x ** 3)
    return F2 * x * (F3 + jnp.tanh(GELU_C * a))


def _row_tile(m: int, n: int, itemsize: int, max_bytes: int = 2 << 20) -> int:
    """Largest multiple-of-8 divisor of `m` such that one (tile, n) block stays
    under `max_bytes`, preferring >= 2 grid steps so the parallel grid axis can
    feed both v7x TensorCores.  Falls back to the full extent (always legal)."""
    t_cap = max(8, (max_bytes // max(1, n * itemsize)) // 8 * 8)
    best = None
    for t in range(8, min(m, t_cap) + 1, 8):
        if m % t == 0:
            if m // t >= 2:
                best = t          # keep overwriting -> largest divisor wins
            elif best is None:
                best = t
    return best if best is not None else m


def new_gelu(x: jax.Array) -> jax.Array:
    orig_shape = x.shape
    total = math.prod(orig_shape) if orig_shape else 1
    if total == 0:
        return x
    itemsize = jnp.dtype(x.dtype).itemsize

    # ---- fallback: tiny / lane-unaligned tensors -> one full-array block ----
    if total % 128 != 0:
        x2 = x.reshape(1, total)
        y2 = pl.pallas_call(
            new_gelu_kernel,
            out_shape=jax.ShapeDtypeStruct(x2.shape, x.dtype),
        )(x2)
        return y2.reshape(orig_shape)

    # ---- lane-dense slab: (M, W) with W a multiple of 128 ----
    # Prefer the original trailing dim when it is already lane-aligned, then
    # widen by absorbing batch elements (flat row-major reshape is free).
    if orig_shape and orig_shape[-1] % 128 == 0:
        n = orig_shape[-1]
    else:
        n = 128
    while n * 2 <= 4096 and total % (n * 2) == 0:
        n *= 2
    m = total // n
    x2 = x.reshape(m, n)

    tile_m = _row_tile(m, n, itemsize)
    grid = (m // tile_m,)

    y2 = pl.pallas_call(
        new_gelu_kernel,
        out_shape=jax.ShapeDtypeStruct((m, n), x.dtype),
        grid=grid,
        in_specs=[pl.BlockSpec((tile_m, n), lambda i: (i, 0))],
        out_specs=pl.BlockSpec((tile_m, n), lambda i: (i, 0)),
        compiler_params=pltpu.CompilerParams(
            dimension_semantics=("parallel",)),
    )(x2)
    return y2.reshape(orig_shape)


if __name__ == "__main__":
    key = jax.random.PRNGKey(0)
    k0, k1 = jax.random.split(key)

    # Shape consistent with where NewGELU sits in minGPT's MLP:
    # (batch=2, seq=8, hidden=4*n_embd=128) — lane-dense trailing dim.
    x = jax.random.normal(k0, (2, 8, 128), jnp.float32)
    y = new_gelu(x)
    jax.block_until_ready(y)
    assert y.shape == x.shape and y.dtype == x.dtype
    assert jnp.allclose(y, new_gelu_ref(x), atol=1e-5, rtol=1e-5)

    # Oddly-shaped input exercises the single-block fallback path.
    x_odd = jax.random.normal(k1, (3, 5, 7), jnp.float32)
    y_odd = new_gelu(x_odd)
    jax.block_until_ready(y_odd)
    assert y_odd.shape == x_odd.shape and y_odd.dtype == x_odd.dtype
    assert jnp.allclose(y_odd, new_gelu_ref(x_odd), atol=1e-5, rtol=1e-5)

    print("KERNEL_OK")
</pallas_src>

<mosaic_0001>
module attributes {stable_mosaic.version = 11 : i64} {
  func.func @new_gelu_kernel(%arg0: i32, %arg1: memref<1x2048xf32, #tpu.memory_space<vmem>>, %arg2: memref<1x2048xf32, #tpu.memory_space<vmem>>) attributes {dimension_semantics = [#tpu.dimension_semantics<parallel>], iteration_bounds = array<i64: 1>, scalar_prefetch = 0 : i64, scratch_operands = 0 : i64, tpu.core_type = #tpu.core_type<tc>, window_params = [{transform_indices = @transform_0, window_bounds = array<i64: 1, 2048>}, {transform_indices = @transform_1, window_bounds = array<i64: 1, 2048>}]} {
    %c0 = arith.constant 0 : index
    %c0_0 = arith.constant 0 : index
    %0 = vector.load %arg1[%c0, %c0_0] : memref<1x2048xf32, #tpu.memory_space<vmem>>, vector<1x2048xf32>
    %1 = arith.mulf %0, %0 : vector<1x2048xf32>
    %2 = arith.mulf %1, %0 : vector<1x2048xf32>
    %cst = arith.constant 4.471500e-02 : f32
    %3 = vector.broadcast %cst : f32 to vector<1x2048xf32>
    %4 = arith.mulf %3, %2 : vector<1x2048xf32>
    %5 = arith.addf %0, %4 : vector<1x2048xf32>
    %cst_1 = arith.constant 5.000000e-01 : f32
    %6 = vector.broadcast %cst_1 : f32 to vector<1x2048xf32>
    %7 = arith.mulf %6, %0 : vector<1x2048xf32>
    %cst_2 = arith.constant 0.797884583 : f32
    %8 = vector.broadcast %cst_2 : f32 to vector<1x2048xf32>
    %9 = arith.mulf %8, %5 : vector<1x2048xf32>
    %10 = math.tanh %9 : vector<1x2048xf32>
    %cst_3 = arith.constant 1.000000e+00 : f32
    %11 = vector.broadcast %cst_3 : f32 to vector<1x2048xf32>
    %12 = arith.addf %11, %10 : vector<1x2048xf32>
    %13 = arith.mulf %7, %12 : vector<1x2048xf32>
    %c0_4 = arith.constant 0 : index
    %c0_5 = arith.constant 0 : index
    %14 = vector.load %arg2[%c0_4, %c0_5] : memref<1x2048xf32, #tpu.memory_space<vmem>>, vector<1x2048xf32>
    tpu.vector_store %arg2[%c0_4, %c0_5], %13 {strides = array<i32>} : memref<1x2048xf32, #tpu.memory_space<vmem>>, vector<1x2048xf32>,
    return
  }
  func.func @transform_0(%arg0: i32) -> (i32, i32) {
    %c0_i32 = arith.constant 0 : i32
    %c0_i32_0 = arith.constant 0 : i32
    return %arg0, %c0_i32 : i32, i32
  }
  func.func @transform_1(%arg0: i32) -> (i32, i32) {
    %c0_i32 = arith.constant 0 : i32
    %c0_i32_0 = arith.constant 0 : i32
    return %arg0, %c0_i32 : i32, i32
  }
}

</mosaic_0001>

<bundles_post_ra>
// kernel: tpu_custom_call.1
= control target key start
LH: loop header
LB: loop body
LE: loop exit
PB: predicated region body
PF: predicated region fallthrough
CT: control target
= control target key end

     0   :  { %6 = vsyncpa [#allocation3], 0  ;;  %s138_s0 = inlined_call_operand.hbm [shape: f32[1,2048], index: 0, kind: input, shape index: {}]   ;;  %s139_s1 = inlined_call_operand.hbm [shape: f32[1,2048], index: 1, kind: output, shape index: {}]  }
   0x1   :  { %7 = vsyncpa [#allocation4], 0  ;;  %s13_s8 = sshll.u32 %s138_s0, 4  ;;  %s120_s9 = smov [#allocation2]   ;;  %s14_s8 = int_to_ptr.hbm [resolvable:$true] %s13_s8 }
   0x2   :  { %s15_s10 = sshll.u32 %s120_s9, 4  ;;  %s16_s10 = int_to_ptr.vmem [resolvable:$true] %s15_s10 }
   0x3   :  { %18 = dma.hbm_to_vmem [thread:$0]  %s14_s8, 256, %s16_s10, [#allocation3]  }
   0x4   :  { %116 = dma.done.wait [#allocation3], 256  }
   0x5   :  { %117 = vsyncadd [#allocation3], 4294967040  ;;  %v23_v0 = vld [vmem:[#allocation2] sm:$0xff]  ;;  %v24_v1 = vld [vmem:[#allocation2 + $0x8] sm:$0xff]  ;;  %s121_s0 = smov [#allocation5]   ;;  %s52_s14 = sshll.u32 %s139_s1, 4  ;;  %s53_s14 = int_to_ptr.hbm [resolvable:$true] %s52_s14 }
   0x6   :  { %v25_v2 = vmul.f32 %v23_v0, %v23_v0  ;;  %v26_v3 = vmul.f32 %v24_v1, %v24_v1  ;;  %v33_v12 = vmul.f32 0.5, %v23_v0  ;;  %v34_v14 = vmul.f32 0.5, %v24_v1  ;;  %s50_s11 = sshll.u32 %s121_s0, 4  ;;  %s51_s11 = int_to_ptr.vmem [resolvable:$true] %s50_s11 }
   0x8   :  { %v27_v4 = vmul.f32 %v25_v2, %v23_v0  ;;  %v28_v5 = vmul.f32 %v26_v3, %v24_v1 }
   0xa   :  { %v29_v6 = vmul.f32 0.044715, %v27_v4  ;;  %v30_v7 = vmul.f32 0.044715, %v28_v5 }
   0xc   :  { %v31_v8 = vadd.f32 %v29_v6, %v23_v0  ;;  %v32_v9 = vadd.f32 %v30_v7, %v24_v1 }
   0xe   :  { %v35_v10 = vmul.f32 0.7978846, %v31_v8  ;;  %v36_v11 = vmul.f32 0.7978846, %v32_v9 }
  0x10   :  { %64 = vtanh.f32 %v35_v10 }
  0x11   :  { %66 = vtanh.f32 %v36_v11 }
  0x16   :  { %v65_v13 = vpop.eup %64 }
  0x17   :  { %v67_v15 = vpop.eup %66  ;;  %v39_v16 = vadd.f32 1.0, %v65_v13 }
  0x18   :  { %v40_v17 = vadd.f32 1.0, %v67_v15 }
  0x19   :  { %v41_v18 = vmul.f32 %v39_v16, %v33_v12 }
  0x1a   :  { %v42_v19 = vmul.f32 %v40_v17, %v34_v14 }
  0x1b   :  { %43 = vst [vmem:[#allocation5] sm:$0xff] %v41_v18 }
  0x1c   :  { %44 = vst [vmem:[#allocation5 + $0x8] sm:$0xff] %v42_v19 }
  0x1d   :  { %55 = dma.vmem_to_hbm [thread:$0]  %s51_s11, 256, %s53_s14, [#allocation4]  }
  0x1e   :  { %118 = dma.done.wait [#allocation4], 256  }
  0x1f   :  { %119 = vsyncadd [#allocation4], 4294967040 }
  0x20   :  { %60 = vsyncpa [#allocation3], 1 }
  0x21   :  { %61 = vsyncpa [#allocation4], 1 }

</bundles_post_ra>
